<compile_context>
chip_gen: v6e
topology: v6e:2x2x1
jax: 0.10.0
libtpu: 0.0.40
codegen_flags: <defaults>
</compile_context>

<pallas_src>
import jax
import jax.numpy as jnp
from jax.experimental import pallas as pl
from jax.experimental.pallas import tpu as pltpu


def _round_up(x: int, m: int) -> int:
    return ((x + m - 1) // m) * m


def asnet_kernel(state_ref, mask_ref, w1_ref, b1_ref, w2_ref, b2_ref, out_ref):
    """Fused fc1 + ReLU + head + legal-action mask + softmax for one batch tile."""
    # fc1 + ReLU: bf16 MXU inputs, f32 accumulation; bias/ReLU in f32 (v5e-safe).
    x = state_ref[...].astype(jnp.bfloat16)                       # [TB, S]
    h = jnp.dot(x, w1_ref[...], preferred_element_type=jnp.float32)
    h = jnp.maximum(h + b1_ref[...], 0.0)                         # [TB, 128] f32

    # head
    logits = jnp.dot(h.astype(jnp.bfloat16), w2_ref[...],
                     preferred_element_type=jnp.float32)
    logits = logits + b2_ref[...]                                 # [TB, A_pad] f32

    # Legal-action masking. For a binary {0,1} mask this matches
    # `logits + (mask - 1) * 1e9` from the PyTorch reference, but is done with
    # a select on an int8 mask (no vsub/vmul, 1 byte/elem of HBM traffic).
    # NOTE: like the PyTorch module, an all-zero mask row degenerates to a
    # plain softmax over (logits - 1e9); callers must guarantee >=1 legal action.
    masked = jnp.where(mask_ref[...] != 0, logits, logits - 1e9)

    # Numerically-stable softmax over the (lane-dense, padded) action axis.
    # Padded columns are "illegal" -> exp underflows to exactly 0.
    m = jnp.max(masked, axis=-1, keepdims=True)
    e = jnp.exp(masked - m)
    denom = jnp.sum(e, axis=-1, keepdims=True)
    out_ref[...] = (e * pl.reciprocal(denom, approx=True)).astype(out_ref.dtype)


def asnet_forward(state, legal_actions_mask, params, *, block_b=2048):
    """Wrapper: pads to lane/sublane-friendly shapes and calls the Pallas kernel."""
    w1, b1, w2, b2 = params["w1"], params["b1"], params["w2"], params["b2"]
    B, S = state.shape
    H = w1.shape[1]
    A = w2.shape[1]

    LANE, SUB = 128, 8
    A_pad = _round_up(A, LANE)

    # Lane-dense head: pad weights/bias/mask along the action axis. Padded
    # columns have mask == 0 -> probability exactly 0; sliced off below.
    w2p = jnp.pad(w2, ((0, 0), (0, A_pad - A)))
    b2p = jnp.pad(b2.astype(jnp.float32), ((0, A_pad - A),)).reshape(1, A_pad)
    b1p = b1.astype(jnp.float32).reshape(1, H)
    mask_i8 = jnp.pad(legal_actions_mask.astype(jnp.int8), ((0, 0), (0, A_pad - A)))

    # Batch tiling: pick a tile (multiple of 8 sublanes, capped at block_b) and
    # pad the batch up to a multiple of it. Tiles are sized to comfortably fit
    # v7x's 64 MiB VMEM even when double-buffered (~3 MiB at TB=2048).
    TB = min(_round_up(block_b, SUB), _round_up(B, SUB))
    B_pad = _round_up(B, TB)
    state_p = state
    if B_pad != B:
        state_p = jnp.pad(state, ((0, B_pad - B), (0, 0)))
        mask_i8 = jnp.pad(mask_i8, ((0, B_pad - B), (0, 0)))

    grid = (B_pad // TB,)

    flops = 2 * B_pad * S * H + 2 * B_pad * H * A_pad
    bytes_accessed = (
        B_pad * S * state_p.dtype.itemsize                 # state in
        + B_pad * A_pad * 1                                # int8 mask in
        + S * H * 2 + H * 4 + H * A_pad * 2 + A_pad * 4    # weights/bias (resident)
        + B_pad * A_pad * 4                                # probs out
    )
    cost = pl.CostEstimate(
        flops=flops,
        transcendentals=B_pad * A_pad + B_pad,             # exp + reciprocal
        bytes_accessed=bytes_accessed,
    )

    out = pl.pallas_call(
        asnet_kernel,
        out_shape=jax.ShapeDtypeStruct((B_pad, A_pad), jnp.float32),
        grid_spec=pltpu.PrefetchScalarGridSpec(
            num_scalar_prefetch=0,
            grid=grid,
            in_specs=[
                pl.BlockSpec((TB, S), lambda i: (i, 0)),        # state: per-tile
                pl.BlockSpec((TB, A_pad), lambda i: (i, 0)),    # mask:  per-tile
                pl.BlockSpec((S, H), lambda i: (0, 0)),         # w1: VMEM-resident
                pl.BlockSpec((1, H), lambda i: (0, 0)),         # b1: VMEM-resident
                pl.BlockSpec((H, A_pad), lambda i: (0, 0)),     # w2: VMEM-resident
                pl.BlockSpec((1, A_pad), lambda i: (0, 0)),     # b2: VMEM-resident
            ],
            out_specs=pl.BlockSpec((TB, A_pad), lambda i: (i, 0)),
        ),
        compiler_params=pltpu.CompilerParams(
            dimension_semantics=("parallel",),      # shard batch across TCs (v7x)
            vmem_limit_bytes=32 * 1024 * 1024,      # explicit; safe on 64 MiB v7x
        ),
        cost_estimate=cost,
    )(state_p, mask_i8, w1, b1p, w2p, b2p)

    return out[:B, :A]


def init_params(key, state_dim, action_dim, hidden=128):
    """PyTorch-Linear-style init (uniform +-1/sqrt(fan_in)).

    Weights are stored transposed ([in, out]) relative to torch's [out, in],
    and kept in bfloat16 (MXU-native, half the HBM bytes); biases stay f32.
    """
    k1, k2, k3, k4 = jax.random.split(key, 4)
    bound1 = 1.0 / jnp.sqrt(state_dim)
    bound2 = 1.0 / jnp.sqrt(hidden)
    return {
        "w1": jax.random.uniform(k1, (state_dim, hidden), jnp.float32,
                                 -bound1, bound1).astype(jnp.bfloat16),
        "b1": jax.random.uniform(k2, (hidden,), jnp.float32, -bound1, bound1),
        "w2": jax.random.uniform(k3, (hidden, action_dim), jnp.float32,
                                 -bound2, bound2).astype(jnp.bfloat16),
        "b2": jax.random.uniform(k4, (action_dim,), jnp.float32, -bound2, bound2),
    }


def asnet_reference(state, mask, params):
    """Pure-JAX reference mirroring the kernel's compute dtypes (bf16 MXU, f32 acc)."""
    h = jnp.dot(state.astype(jnp.bfloat16), params["w1"],
                preferred_element_type=jnp.float32) + params["b1"]
    h = jnp.maximum(h, 0.0)
    logits = jnp.dot(h.astype(jnp.bfloat16), params["w2"],
                     preferred_element_type=jnp.float32) + params["b2"]
    masked = logits + (mask - 1.0) * 1000000000.0
    return jax.nn.softmax(masked, axis=-1)


if __name__ == "__main__":
    B, STATE_DIM, ACTION_DIM = 8, 32, 16

    key = jax.random.PRNGKey(0)
    kp, ks, km = jax.random.split(key, 3)

    params = init_params(kp, STATE_DIM, ACTION_DIM)
    state = jax.random.normal(ks, (B, STATE_DIM), jnp.float32)
    # Binary legal-actions mask; guarantee at least one legal action per row.
    legal_mask = (jax.random.uniform(km, (B, ACTION_DIM)) > 0.5).astype(jnp.float32)
    legal_mask = legal_mask.at[:, 0].set(1.0)

    probs = asnet_forward(state, legal_mask, params)
    probs = jax.block_until_ready(probs)

    ref = asnet_reference(state, legal_mask, params)
    assert probs.shape == (B, ACTION_DIM)
    # Tolerances account for the approx (EUP) reciprocal in the softmax denom.
    assert jnp.allclose(probs, ref, atol=2e-3, rtol=2e-2), "mismatch vs reference"
    assert jnp.allclose(jnp.sum(probs, axis=-1), 1.0, atol=5e-3)
    # Illegal actions must get (near-)zero probability.
    assert jnp.all(jnp.where(legal_mask == 0.0, probs, 0.0) < 1e-6)

    print("KERNEL_OK")
</pallas_src>

<mosaic_0001>
module attributes {stable_mosaic.version = 11 : i64} {
  func.func @asnet_kernel(%arg0: i32, %arg1: memref<8x32xf32, #tpu.memory_space<vmem>>, %arg2: memref<8x128xi8, #tpu.memory_space<vmem>>, %arg3: memref<32x128xbf16, #tpu.memory_space<vmem>>, %arg4: memref<1x128xf32, #tpu.memory_space<vmem>>, %arg5: memref<128x128xbf16, #tpu.memory_space<vmem>>, %arg6: memref<1x128xf32, #tpu.memory_space<vmem>>, %arg7: memref<8x128xf32, #tpu.memory_space<vmem>>) attributes {dimension_semantics = [#tpu.dimension_semantics<parallel>], iteration_bounds = array<i64: 1>, scalar_prefetch = 0 : i64, scratch_operands = 0 : i64, tpu.core_type = #tpu.core_type<tc>, window_params = [{transform_indices = @transform_0, window_bounds = array<i64: 8, 32>}, {transform_indices = @transform_1, window_bounds = array<i64: 8, 128>}, {pipeline_mode = #tpu.pipeline_mode<synchronous>, transform_indices = @transform_2, window_bounds = array<i64: 32, 128>}, {pipeline_mode = #tpu.pipeline_mode<synchronous>, transform_indices = @transform_3, window_bounds = array<i64: 1, 128>}, {pipeline_mode = #tpu.pipeline_mode<synchronous>, transform_indices = @transform_4, window_bounds = array<i64: 128, 128>}, {pipeline_mode = #tpu.pipeline_mode<synchronous>, transform_indices = @transform_5, window_bounds = array<i64: 1, 128>}, {transform_indices = @transform_6, window_bounds = array<i64: 8, 128>}]} {
    %c0 = arith.constant 0 : index
    %c0_0 = arith.constant 0 : index
    %0 = vector.load %arg1[%c0, %c0_0] : memref<8x32xf32, #tpu.memory_space<vmem>>, vector<8x32xf32>
    %1 = arith.truncf %0 : vector<8x32xf32> to vector<8x32xbf16>
    %c0_1 = arith.constant 0 : index
    %c0_2 = arith.constant 0 : index
    %2 = vector.load %arg3[%c0_1, %c0_2] : memref<32x128xbf16, #tpu.memory_space<vmem>>, vector<32x128xbf16>
    %cst = arith.constant dense<0.000000e+00> : vector<8x128xf32>
    %3 = tpu.matmul %1, %2, %cst {dimension_numbers = #tpu.dot_dimension_numbers<[1], [0], [0], [1], [0, 0, 1, 1], [], []>} : vector<8x32xbf16>, vector<32x128xbf16>, vector<8x128xf32> -> vector<8x128xf32>
    %c0_3 = arith.constant 0 : index
    %c0_4 = arith.constant 0 : index
    %4 = vector.load %arg4[%c0_3, %c0_4] : memref<1x128xf32, #tpu.memory_space<vmem>>, vector<1x128xf32>
    %5 = vector.broadcast %4 : vector<1x128xf32> to vector<8x128xf32>
    %6 = arith.addf %3, %5 : vector<8x128xf32>
    %cst_5 = arith.constant 0.000000e+00 : f32
    %7 = vector.broadcast %cst_5 : f32 to vector<8x128xf32>
    %8 = arith.maximumf %6, %7 : vector<8x128xf32>
    %9 = arith.truncf %8 : vector<8x128xf32> to vector<8x128xbf16>
    %c0_6 = arith.constant 0 : index
    %c0_7 = arith.constant 0 : index
    %10 = vector.load %arg5[%c0_6, %c0_7] : memref<128x128xbf16, #tpu.memory_space<vmem>>, vector<128x128xbf16>
    %cst_8 = arith.constant dense<0.000000e+00> : vector<8x128xf32>
    %11 = tpu.matmul %9, %10, %cst_8 {dimension_numbers = #tpu.dot_dimension_numbers<[1], [0], [0], [1], [0, 0, 1, 1], [], []>} : vector<8x128xbf16>, vector<128x128xbf16>, vector<8x128xf32> -> vector<8x128xf32>
    %c0_9 = arith.constant 0 : index
    %c0_10 = arith.constant 0 : index
    %12 = vector.load %arg6[%c0_9, %c0_10] : memref<1x128xf32, #tpu.memory_space<vmem>>, vector<1x128xf32>
    %13 = vector.broadcast %12 : vector<1x128xf32> to vector<8x128xf32>
    %14 = arith.addf %11, %13 : vector<8x128xf32>
    %c0_11 = arith.constant 0 : index
    %c0_12 = arith.constant 0 : index
    %15 = vector.load %arg2[%c0_11, %c0_12] : memref<8x128xi8, #tpu.memory_space<vmem>>, vector<8x128xi8>
    %c0_i8 = arith.constant 0 : i8
    %16 = vector.broadcast %c0_i8 : i8 to vector<8x128xi8>
    %17 = arith.cmpi ne, %15, %16 : vector<8x128xi8>
    %cst_13 = arith.constant 1.000000e+09 : f32
    %18 = vector.broadcast %cst_13 : f32 to vector<8x128xf32>
    %19 = arith.subf %14, %18 : vector<8x128xf32>
    %20 = arith.select %17, %14, %19 : vector<8x128xi1>, vector<8x128xf32>
    %cst_14 = arith.constant dense<0xFF800000> : vector<8xf32>
    %21 = vector.multi_reduction <maximumf>, %20, %cst_14 [1] : vector<8x128xf32> to vector<8xf32>
    %22 = vector.shape_cast %21 : vector<8xf32> to vector<8x1xf32>
    %23 = vector.broadcast %22 : vector<8x1xf32> to vector<8x128xf32>
    %24 = arith.subf %20, %23 : vector<8x128xf32>
    %25 = math.exp %24 : vector<8x128xf32>
    %cst_15 = arith.constant dense<0.000000e+00> : vector<8xf32>
    %26 = vector.multi_reduction <add>, %25, %cst_15 [1] : vector<8x128xf32> to vector<8xf32>
    %27 = vector.shape_cast %26 : vector<8xf32> to vector<8x1xf32>
    %28 = tpu.reciprocal %27 {approx = true} : vector<8x1xf32> -> vector<8x1xf32>
    %29 = vector.broadcast %28 : vector<8x1xf32> to vector<8x128xf32>
    %30 = arith.mulf %25, %29 : vector<8x128xf32>
    %c0_16 = arith.constant 0 : index
    %c0_17 = arith.constant 0 : index
    %31 = vector.load %arg7[%c0_16, %c0_17] : memref<8x128xf32, #tpu.memory_space<vmem>>, vector<8x128xf32>
    tpu.vector_store %arg7[%c0_16, %c0_17], %30 {strides = array<i32>} : memref<8x128xf32, #tpu.memory_space<vmem>>, vector<8x128xf32>,
    return
  }
  func.func @transform_0(%arg0: i32) -> (i32, i32) {
    %c0_i32 = arith.constant 0 : i32
    %c0_i32_0 = arith.constant 0 : i32
    return %arg0, %c0_i32 : i32, i32
  }
  func.func @transform_1(%arg0: i32) -> (i32, i32) {
    %c0_i32 = arith.constant 0 : i32
    %c0_i32_0 = arith.constant 0 : i32
    return %arg0, %c0_i32 : i32, i32
  }
  func.func @transform_2(%arg0: i32) -> (i32, i32) {
    %c0_i32 = arith.constant 0 : i32
    %c0_i32_0 = arith.constant 0 : i32
    %c0_i32_1 = arith.constant 0 : i32
    return %c0_i32, %c0_i32_0 : i32, i32
  }
  func.func @transform_3(%arg0: i32) -> (i32, i32) {
    %c0_i32 = arith.constant 0 : i32
    %c0_i32_0 = arith.constant 0 : i32
    %c0_i32_1 = arith.constant 0 : i32
    return %c0_i32, %c0_i32_0 : i32, i32
  }
  func.func @transform_4(%arg0: i32) -> (i32, i32) {
    %c0_i32 = arith.constant 0 : i32
    %c0_i32_0 = arith.constant 0 : i32
    %c0_i32_1 = arith.constant 0 : i32
    return %c0_i32, %c0_i32_0 : i32, i32
  }
  func.func @transform_5(%arg0: i32) -> (i32, i32) {
    %c0_i32 = arith.constant 0 : i32
    %c0_i32_0 = arith.constant 0 : i32
    %c0_i32_1 = arith.constant 0 : i32
    return %c0_i32, %c0_i32_0 : i32, i32
  }
  func.func @transform_6(%arg0: i32) -> (i32, i32) {
    %c0_i32 = arith.constant 0 : i32
    %c0_i32_0 = arith.constant 0 : i32
    return %arg0, %c0_i32 : i32, i32
  }
}

</mosaic_0001>

<bundles_post_ra>
// kernel: tpu_custom_call.1
= control target key start
LH: loop header
LB: loop body
LE: loop exit
PB: predicated region body
PF: predicated region fallthrough
CT: control target
= control target key end

     0   :  { %11 = vsyncpa [#allocation3], 0  ;;  %s546_s0 = inlined_call_operand.hbm [shape: f32[8,32], index: 0, kind: input, shape index: {}]   ;;  %s547_s1 = inlined_call_operand.hbm [shape: s8[8,128], index: 1, kind: input, shape index: {}]   ;;  %s548_s2 = inlined_call_operand.hbm [shape: bf16[32,128], index: 2, kind: input, shape index: {}]   ;;  %s549_s3 = inlined_call_operand.vmem [shape: f32[1,128], index: 3, kind: input, shape index: {}]   ;;  %s550_s4 = inlined_call_operand.hbm [shape: bf16[128,128], index: 4, kind: input, shape index: {}]   ;;  %s551_s5 = inlined_call_operand.vmem [shape: f32[1,128], index: 5, kind: input, shape index: {}]   ;;  %s552_s6 = inlined_call_operand.hbm [shape: f32[8,128], index: 6, kind: output, shape index: {}]  }
   0x1   :  { %12 = vsyncpa [#allocation6], 0 }
   0x2   :  { %13 = vsyncpa [#allocation9], 0 }
   0x3   :  { %14 = vsyncpa [#allocation4], 0  ;;  %s480_s21 = smov [#allocation5]   ;;  %s481_s23 = smov [#allocation2]  }
   0x4   :  { %s31_s22 = sshll.u32 %s480_s21, 4  ;;  %s21_s24 = sshll.u32 %s481_s23, 4  ;;  %s32_s22 = int_to_ptr.vmem [resolvable:$true] %s31_s22  ;;  %s22_s24 = int_to_ptr.vmem [resolvable:$true] %s21_s24 }
   0x5   :  { %s380_s25 = scalar_lea.vmem %s32_s22, 32  ;;  %p385_p1 = scmp.lt.s32.totalorder %s32_s22, %s32_s22 }
   0x6   :  { %p381_p0 = scmp.ne.s32.totalorder %s32_s22, %s380_s25  ;;  %p386_p2 = scmp.lt.s32.totalorder %s380_s25, %s380_s25 }
   0x8   :  { %p387_p3 = por %p386_p2, %p385_p1 }
   0xa   :  { %p388_p4 = pnand %p387_p3, %p381_p0 }
   0xc   :  { %391 = shalt.err (!%p388_p4)
}
   0xd   :  { %34 = dma.hbm_to_vmem [thread:$0]  %s547_s1, 32, %s32_s22, [#allocation6]  }
   0xe   :  { %s400_s28 = scalar_lea.vmem %s22_s24, 128  ;;  %p405_p6 = scmp.lt.s32.totalorder %s22_s24, %s22_s24 }
   0xf   :  { %p401_p5 = scmp.ne.s32.totalorder %s22_s24, %s400_s28  ;;  %p406_p7 = scmp.lt.s32.totalorder %s400_s28, %s400_s28 }
  0x11   :  { %p407_p8 = por %p406_p7, %p405_p6 }
  0x13   :  { %p408_p9 = pnand %p407_p8, %p401_p5 }
  0x15   :  { %411 = shalt.err (!%p408_p9)
}
  0x16   :  { %24 = dma.hbm_to_vmem [thread:$0]  %s546_s0, 128, %s22_s24, [#allocation3]  }
  0x17   :  { %s482_s7 = smov [#allocation7]  }
  0x18   :  { %s40_s8 = sshll.u32 %s482_s7, 4  ;;  %s41_s8 = int_to_ptr.vmem [resolvable:$true] %s40_s8 }
  0x19   :  { %s420_s9 = scalar_lea.vmem %s41_s8, 256  ;;  %p425_p11 = scmp.lt.s32.totalorder %s41_s8, %s41_s8 }
  0x1a   :  { %p421_p10 = scmp.ne.s32.totalorder %s41_s8, %s420_s9  ;;  %p426_p12 = scmp.lt.s32.totalorder %s420_s9, %s420_s9 }
  0x1c   :  { %p427_p13 = por %p426_p12, %p425_p11 }
  0x1e   :  { %p428_p0 = pnand %p427_p13, %p421_p10 }
  0x20   :  { %431 = shalt.err (!%p428_p0)
}
  0x21   :  { %s483_s1 = smov 64   ;;  %s484_s10 = smov 4  }
  0x22   :  { %46 = dma.hbm_to_vmem [thread:$0]  %s548_s2, 256, %s41_s8, [#allocation6], %s483_s1, %s483_s1, %s484_s10  }
  0x23   :  { %s485_s13 = smov [#allocation8]  }
  0x24   :  { %s54_s14 = sshll.u32 %s485_s13, 4  ;;  %s55_s14 = int_to_ptr.vmem [resolvable:$true] %s54_s14 }
  0x25   :  { %s440_s0 = scalar_lea.vmem %s55_s14, 1024  ;;  %p445_p2 = scmp.lt.s32.totalorder %s55_s14, %s55_s14 }
  0x26   :  { %p441_p1 = scmp.ne.s32.totalorder %s55_s14, %s440_s0  ;;  %p446_p3 = scmp.lt.s32.totalorder %s440_s0, %s440_s0 }
  0x28   :  { %p447_p4 = por %p446_p3, %p445_p2 }
  0x2a   :  { %p448_p5 = pnand %p447_p4, %p441_p1 }
  0x2c   :  { %451 = shalt.err (!%p448_p5)
}
  0x2d   :  { %60 = dma.hbm_to_vmem [thread:$0]  %s550_s4, 1024, %s55_s14, [#allocation9], %s483_s1, %s483_s1, %s484_s10  }
  0x2e   :  { %472 = dma.done.wait [#allocation3], 128  }
  0x2f   :  { %473 = vsyncadd [#allocation3], 4294967168 }
  0x30   :  { %474 = dma.done.wait [#allocation6], 288  }
  0x31   :  { %475 = vsyncadd [#allocation6], 4294967008 }
  0x32   :  { %476 = dma.done.wait [#allocation9], 1024  }
  0x33   :  { %477 = vsyncadd [#allocation9], 4294966272  ;;  %v486_v0 = vmov 0.0   ;;  %vm487_vm0 = vmmov 0   ;;  %v358_v1 = vld [vmem:[#allocation7 + $0x8] sm:$0xff]   ;;  %v359_v2 = vld [vmem:[#allocation7] sm:$0xff]  }
  0x34   :  { %320 = vmatprep.subr.bf16.mxu0 %v486_v0  ;;  %324 = vmatprep.mubr.msk.bf16.mxu0 %vm487_vm0, %v486_v0  ;;  %v78_v3 = vld [vmem:[#allocation2] sm:$0xff]  ;;  %v360_v4 = vld [vmem:[#allocation8 + $0x38] sm:$0xff]   ;;  %v361_v6 = vld [vmem:[#allocation8 + $0x30] sm:$0xff]   ;;  %vm103_vm1 = vcmask 261120   ;;  %v488_v22 = vmov 0  }
  0x35   :  { %328 = vmatprep.subr.bf16.mxu1 %v486_v0  ;;  %344 = vmatprep.mubr.msk.bf16.mxu1 %vm487_vm0, %v486_v0  ;;  %v79_v5 = vpack.c.bf16 %v78_v3, %v78_v3  ;;  %v362_v7 = vld [vmem:[#allocation8 + $0x28] sm:$0xff]   ;;  %v363_v8 = vld [vmem:[#allocation8 + $0x20] sm:$0xff]   ;;  %v364_v9 = vld [vmem:[#allocation8 + $0x18] sm:$0xff]  }
  0x36   :  { %321 = vmatpush3.bf16.msra.mxu0 %v358_v1  ;;  %329 = vmatpush3.bf16.msra.mxu1 %v360_v4  ;;  %v365_v10 = vld [vmem:[#allocation8 + $0x10] sm:$0xff]   ;;  %v366_v11 = vld [vmem:[#allocation8 + $0x8] sm:$0xff]   ;;  %v367_v12 = vld [vmem:[#allocation8] sm:$0xff]  }
  0x37   :  { %322 = vmatprep.subr.bf16.mxu0 %v486_v0  ;;  %330 = vmatprep.subr.bf16.mxu1 %v486_v0  ;;  %v294_v13 = vld [vmem:[%s549_s3] ss:$0 sm:$0xff]  ;;  %v260_v21 = vld [vmem:[#allocation5] sm:$0x3]  ;;  %s489_s3 = smov [#allocation10]  }
  0x38   :  { %vm261_vm2 = vnez %v260_v21  ;;  %v298_v24 = vld [vmem:[%s551_s5] ss:$0 sm:$0xff]  ;;  %s283_s5 = sshll.u32 %s489_s3, 4  ;;  %s284_s5 = int_to_ptr.vmem [resolvable:$true] %s283_s5 }
  0x39   :  { %v263_v23 = vsel %vm261_vm2, 16843009, %v488_v22  ;;  %s452_s19 = scalar_lea.vmem %s284_s5, 128  ;;  %p457_p7 = scmp.lt.s32.totalorder %s284_s5, %s284_s5 }
  0x3a   :  { %323 = vmatpush3.bf16.msra.mxu0 %v359_v2  ;;  %331 = vmatpush3.bf16.msra.mxu1 %v361_v6  ;;  %v264_v25 = vunpack.c.0.s8 %v263_v23  ;;  %p453_p6 = scmp.ne.s32.totalorder %s284_s5, %s452_s19  ;;  %p458_p8 = scmp.lt.s32.totalorder %s452_s19, %s452_s19 }
  0x3b   :  { %332 = vmatprep.subr.bf16.mxu1 %v486_v0 }
  0x3c   :  { %vm265_vm3 = vcmp.ne.s32.totalorder %v264_v25, 0  ;;  %p459_p9 = por %p458_p8, %p457_p7 }
  0x3d   :  { %325 = vmatmul.mubr.msk.bf16.vlgmr.msra.gmra.mxu0 %vm103_vm1, %v79_v5 }
  0x3e   :  { %333 = vmatpush3.bf16.msra.mxu1 %v362_v7  ;;  %p460_p10 = pnand %p459_p9, %p453_p6 }
  0x3f   :  { %334 = vmatprep.subr.bf16.mxu1 %v486_v0 }
  0x42   :  { %335 = vmatpush3.bf16.msra.mxu1 %v363_v8 }
  0x43   :  { %336 = vmatprep.subr.bf16.mxu1 %v486_v0 }
  0x46   :  { %337 = vmatpush3.bf16.msra.mxu1 %v364_v9 }
  0x47   :  { %338 = vmatprep.subr.bf16.mxu1 %v486_v0 }
  0x4a   :  { %339 = vmatpush3.bf16.msra.mxu1 %v365_v10 }
  0x4b   :  { %340 = vmatprep.subr.bf16.mxu1 %v486_v0 }
  0x4e   :  { %341 = vmatpush3.bf16.msra.mxu1 %v366_v11 }
  0x4f   :  { %342 = vmatprep.subr.bf16.mxu1 %v486_v0 }
  0x52   :  { %343 = vmatpush3.bf16.msra.mxu1 %v367_v12 }
  0xfd   :  { %v141_v14 = vpop.f32.mrf.mxu0 }
  0xfe   :  { %v142_v15 = vadd.f32 %v294_v13, %v141_v14 }
  0xff   :  { %v326_v16 = vpop.f32.mrf.mxu0 }
 0x100   :  { %v147_v17 = vmax.f32 %v142_v15, 0.0 }
 0x101   :  { %v144_v18 = vpop.f32.mrf.mxu0 }
 0x102   :  { %v148_v19 = vpack.c.bf16 %v147_v17, %v147_v17 }
 0x103   :  { %v327_v20 = vpop.f32.mrf.mxu0 }
 0x104   :  { %345 = vmatmul.mubr.bf16.vlgmr.msra.gmra.mxu1 %v148_v19 }
 0x1c4   :  { %v254_v26 = vpop.f32.mrf.mxu1 }
 0x1c5   :  { %v255_v27 = vadd.f32 %v298_v24, %v254_v26 }
 0x1c6   :  { %v346_v28 = vpop.f32.mrf.mxu1 }
 0x1c7   :  { %v307_v29 = vadd.f32 -1e+09, %v255_v27 }
 0x1c8   :  { %v257_v30 = vpop.f32.mrf.mxu1 }
 0x1c9   :  { %v266_v31 = vsel %vm265_vm3, %v255_v27, %v307_v29 }
 0x1ca   :  { %267 = vmax.xlane.f32.xlu0 %v266_v31  ;;  %v347_v32 = vpop.f32.mrf.mxu1 }
 0x253   :  { %v268_v33 = vpop.xlane.xlu0 %267 }
 0x254   :  { %v269_v34 = vsub.f32 %v266_v31, %v268_v33 }
 0x256   :  { %v270_v35 = vmul.f32 1.442695, %v269_v34 }
 0x258   :  { %368 = vpow2.f32 %v270_v35 }
 0x265   :  { %v369_v36 = vpop.eup %368 }
 0x266   :  { %272 = vadd.xlane.f32.xlu0 %v369_v36 }
 0x2ef   :  { %v273_v37 = vpop.xlane.xlu0 %272 }
 0x2f0   :  { %370 = vrcp.f32 %v273_v37 }
 0x2fd   :  { %v371_v38 = vpop.eup %370 }
 0x2fe   :  { %v275_v39 = vmul.f32 %v371_v38, %v369_v36 }
 0x300   :  { %276 = vst [vmem:[#allocation10] sm:$0xff] %v275_v39 }
 0x301   :  { %463 = shalt.err (!%p460_p10)
}
 0x302   :  { %286 = dma.vmem_to_hbm [thread:$0]  %s284_s5, 128, %s552_s6, [#allocation4]  }
 0x303   :  { %478 = dma.done.wait [#allocation4], 128  }
 0x304   :  { %479 = vsyncadd [#allocation4], 4294967168 }
 0x305   :  { %290 = vsyncpa [#allocation3], 1 }
 0x306   :  { %291 = vsyncpa [#allocation6], 1 }
 0x307   :  { %292 = vsyncpa [#allocation9], 1 }
 0x308   :  { %293 = vsyncpa [#allocation4], 1 }

</bundles_post_ra>
